<compile_context>
chip_gen: v7x
topology: tpu7x:2x2x1
jax: 0.10.0
libtpu: 0.0.40
codegen_flags: <defaults>
</compile_context>

<pallas_src>
import functools

import jax
import jax.numpy as jnp
from jax.experimental import pallas as pl
from jax.experimental.pallas import tpu as pltpu

H1, H2 = 128, 64
_MAX_TB = 16 * 1024            # hard ceiling on rows per batch tile, even for tiny F


def _round_up(n: int, m: int) -> int:
    return ((n + m - 1) // m) * m


def _tpu_vmem_capacity_bytes() -> int:
    """Physical per-core VMEM (128 MiB on v5e/v6e, 64 MiB on v7x), with safe fallbacks."""
    try:
        cap = getattr(pltpu.get_tpu_info(), "vmem_capacity_bytes", None)
        if cap:
            return int(cap)
    except Exception:
        pass
    try:
        kind = jax.devices()[0].device_kind.lower()
    except Exception:
        kind = ""
    return 64 * 1024 * 1024 if "v7" in kind else 128 * 1024 * 1024


def _vmem_limit_bytes() -> int:
    """Generation-aware scoped-VMEM request: half the physical VMEM, clamped to a sane range."""
    cap = _tpu_vmem_capacity_bytes()
    return int(min(max(cap // 2, 16 * 1024 * 1024), 64 * 1024 * 1024))


def _epilogue_dtype():
    """bf16 bias/ReLU epilogue on chips with a bf16 VPU (v6e/v7x); f32 on v5e and older."""
    try:
        kind = jax.devices()[0].device_kind.lower()
    except Exception:
        kind = ""
    for old in ("v2", "v3", "v4", "v5"):
        if old in kind:
            return jnp.float32
    return jnp.bfloat16


def _pick_block_b(batch: int, in_features: int, vmem_budget: int) -> int:
    """Batch tile: multiple of 128, as large as the VMEM budget allows (amortizes the
    ~0.35us per-grid-step overhead), but small enough that the padded batch still splits
    into >= 2 tiles so both v7x TensorCores get work."""
    b_pad128 = _round_up(max(batch, 1), 128)
    # Per-row VMEM footprint (bytes): f32 x double-buffer + bf16 x copy + h1/h2
    # intermediates (counted at f32+bf16 to stay safe for the v5e f32 epilogue) + slack.
    per_row = 2 * in_features * 4 + in_features * 2 + H1 * (4 + 2) + H2 * (4 + 2) + 16
    tb = vmem_budget // max(1, per_row)
    tb = max(128, min(_MAX_TB, (tb // 128) * 128))
    if b_pad128 >= 256:
        # Guarantee >= 2 grid tiles (megacore / v7x 2-TC sharding of the batch axis).
        tb = min(tb, max(128, (b_pad128 // 2) // 128 * 128))
    else:
        tb = min(tb, b_pad128)
    return tb


def mlp2_kernel(x_ref, w1_ref, b1_ref, w2_ref, b2_ref, w3_ref, b3_ref, o_ref):
    # x tile: [TB, F] -> bf16 for the MXU (no-op if the caller already streams bf16).
    x = x_ref[...].astype(jnp.bfloat16)

    # Layer 1: Linear(F -> 128) + ReLU.  bf16 MXU operands, f32 accumulation; the
    # bias-add/ReLU epilogue runs in the bias dtype (bf16 on v6e/v7x, f32 on v5e).
    h1 = jnp.dot(x, w1_ref[...], preferred_element_type=jnp.float32)
    b1 = b1_ref[...]
    h1 = jnp.maximum(h1.astype(b1.dtype) + b1, 0).astype(jnp.bfloat16)   # [TB, 128]

    # Dropout(0.3): identity in eval/inference mode.
    # TODO(synk): training-mode dropout (pltpu.prng_seed + Bernoulli mask, 1/0.7 rescale).

    # Layer 2: Linear(128 -> 64) + ReLU.
    h2 = jnp.dot(h1, w2_ref[...], preferred_element_type=jnp.float32)
    b2 = b2_ref[...]
    h2 = jnp.maximum(h2.astype(b2.dtype) + b2, 0).astype(jnp.bfloat16)   # [TB, 64]

    # Layer 3: Linear(64 -> 1), computed as w3_row @ h2^T so the per-tile result is the
    # lane-dense row [1, TB] (unmasked vst) instead of a lane-width-1 [TB, 1] column.
    # TODO(synk): if the lowering materializes an h2 relayout, switch to a VPU multiply
    # by broadcast w3 plus a lane reduction; the M=1 MXU pass itself is negligible.
    out = jax.lax.dot_general(
        w3_ref[...], h2,
        dimension_numbers=(((1,), (1,)), ((), ())),
        preferred_element_type=jnp.float32)                              # f32 [1, TB]
    o_ref[...] = (out + b3_ref[0]).astype(o_ref.dtype)


@functools.partial(jax.jit, static_argnames=("block_b",))
def mlp2_forward(x, params, *, block_b=None):
    """x: [B, in_features] float32 (or bfloat16) -> [B, 1] float32."""
    w1, b1, w2, b2, w3, b3 = params
    B, F = x.shape

    vmem_limit = _vmem_limit_bytes()
    TB = block_b if block_b is not None else _pick_block_b(B, F, vmem_limit // 2)
    B_pad = _round_up(B, TB)
    n_tiles = B_pad // TB
    if B_pad != B:                                   # pad -> no ragged / OOB tail tile
        x = jnp.pad(x, ((0, B_pad - B), (0, 0)))

    ep = _epilogue_dtype()
    # Weights cast to bf16 once; biases to the epilogue dtype.  All stay VMEM-resident
    # across grid steps via constant index_maps.
    w1b = w1.astype(jnp.bfloat16)                    # [F, 128]
    w2b = w2.astype(jnp.bfloat16)                    # [128, 64]
    w3b = w3.T.astype(jnp.bfloat16)                  # [1, 64]
    b1e = b1.astype(ep)                              # [1, 128]
    b2e = b2.astype(ep)                              # [1, 64]
    b3s = b3.reshape((1,)).astype(jnp.float32)       # scalar -> SMEM

    # TODO(synk): single-buffer these constant blocks (pipeline_mode=pl.Buffered(1)) once
    # verified on the top-level TPU pipeline; at hidden sizes 128/64 the extra buffer is
    # small and already accounted for in the VMEM budget above.
    const = lambda a: pl.BlockSpec(a.shape, lambda i: (0,) * a.ndim)

    flops = 2 * B_pad * (F * H1 + H1 * H2 + H2)
    bytes_accessed = int(B_pad * F * x.dtype.itemsize
                         + (w1b.size + w2b.size + w3b.size) * 2
                         + b1e.size * b1e.dtype.itemsize
                         + b2e.size * b2e.dtype.itemsize
                         + 4 + B_pad * 4)

    out = pl.pallas_call(
        mlp2_kernel,
        out_shape=jax.ShapeDtypeStruct((n_tiles, 1, TB), jnp.float32),
        grid=(n_tiles,),
        in_specs=[
            pl.BlockSpec((TB, F), lambda i: (i, 0)),                 # x: streamed per tile
            const(w1b), const(b1e), const(w2b), const(b2e), const(w3b),
            pl.BlockSpec(memory_space=pltpu.MemorySpace.SMEM),       # b3 scalar
        ],
        out_specs=pl.BlockSpec((None, 1, TB), lambda i: (i, 0, 0)),  # lane-dense row/tile
        compiler_params=pltpu.CompilerParams(
            dimension_semantics=("parallel",),
            vmem_limit_bytes=vmem_limit),
        cost_estimate=pl.CostEstimate(
            flops=flops, transcendentals=0, bytes_accessed=bytes_accessed),
    )(x, w1b, b1e, w2b, b2e, w3b, b3s)

    return out.reshape(B_pad, 1)[:B]


def init_params(key, in_features):
    """Parameter shapes matching the PyTorch module, stored in x @ W form:
    w1 [F,128], w2 [128,64], w3 [64,1]; biases [1,F_out]."""
    ks = jax.random.split(key, 6)

    def uniform_init(kw, kb, fan_in, fan_out):
        bound = 1.0 / jnp.sqrt(fan_in)
        w = jax.random.uniform(kw, (fan_in, fan_out), jnp.float32, -bound, bound)
        b = jax.random.uniform(kb, (1, fan_out), jnp.float32, -bound, bound)
        return w, b

    w1, b1 = uniform_init(ks[0], ks[1], in_features, H1)
    w2, b2 = uniform_init(ks[2], ks[3], H1, H2)
    w3, b3 = uniform_init(ks[4], ks[5], H2, 1)
    return (w1, b1, w2, b2, w3, b3)


def mlp2_reference(x, params, *, compute_dtype=jnp.bfloat16, epilogue_dtype=jnp.float32):
    """Pure-JAX reference mirroring the kernel's precision (bf16 MXU operands, f32
    accumulation, bias/ReLU epilogue in `epilogue_dtype`)."""
    w1, b1, w2, b2, w3, b3 = params
    c = lambda a: a.astype(compute_dtype)
    e = lambda a: a.astype(epilogue_dtype)
    h1 = jnp.dot(c(x), c(w1), preferred_element_type=jnp.float32)
    h1 = jnp.maximum(e(h1) + e(b1), 0)
    h2 = jnp.dot(c(h1), c(w2), preferred_element_type=jnp.float32)
    h2 = jnp.maximum(e(h2) + e(b2), 0)
    out = jnp.dot(c(h2), c(w3), preferred_element_type=jnp.float32)
    return out.astype(jnp.float32) + b3


if __name__ == "__main__":
    key = jax.random.PRNGKey(0)
    k_x, k_p, k_x2 = jax.random.split(key, 3)
    ep = _epilogue_dtype()

    # Small primary shapes consistent with the module.
    B, in_features = 8, 32
    x = jax.random.normal(k_x, (B, in_features), jnp.float32)
    params = init_params(k_p, in_features)

    out = jax.block_until_ready(mlp2_forward(x, params))
    ref = mlp2_reference(x, params, epilogue_dtype=ep)
    assert out.shape == (B, 1), out.shape
    assert jnp.allclose(out, ref, atol=2e-3, rtol=2e-3), float(jnp.max(jnp.abs(out - ref)))

    # Multi-tile + padded-tail path (3 batch tiles of 128 rows; shards across v7x TCs).
    B2 = 300
    x2 = jax.random.normal(k_x2, (B2, in_features), jnp.float32)
    out2 = jax.block_until_ready(mlp2_forward(x2, params, block_b=128))
    ref2 = mlp2_reference(x2, params, epilogue_dtype=ep)
    assert out2.shape == (B2, 1), out2.shape
    assert jnp.allclose(out2, ref2, atol=2e-3, rtol=2e-3), float(jnp.max(jnp.abs(out2 - ref2)))

    # Auto-tiled path: heuristic must pick >= 2 tiles for a 512-row batch (2-TC rule).
    B3 = 512
    x3 = jax.random.normal(k_x, (B3, in_features), jnp.float32)
    assert _pick_block_b(B3, in_features, _vmem_limit_bytes() // 2) <= B3 // 2
    out3 = jax.block_until_ready(mlp2_forward(x3, params))
    ref3 = mlp2_reference(x3, params, epilogue_dtype=ep)
    assert out3.shape == (B3, 1), out3.shape
    assert jnp.allclose(out3, ref3, atol=2e-3, rtol=2e-3), float(jnp.max(jnp.abs(out3 - ref3)))

    print("KERNEL_OK")
</pallas_src>

<mosaic_0001>
module attributes {stable_mosaic.version = 11 : i64} {
  func.func @mlp2_kernel(%arg0: i32, %arg1: memref<128x32xf32, #tpu.memory_space<vmem>>, %arg2: memref<32x128xbf16, #tpu.memory_space<vmem>>, %arg3: memref<1x128xbf16, #tpu.memory_space<vmem>>, %arg4: memref<128x64xbf16, #tpu.memory_space<vmem>>, %arg5: memref<1x64xbf16, #tpu.memory_space<vmem>>, %arg6: memref<1x64xbf16, #tpu.memory_space<vmem>>, %arg7: memref<1xf32, #tpu.memory_space<smem>>, %arg8: memref<1x1x128xf32, #tpu.memory_space<vmem>>) attributes {dimension_semantics = [#tpu.dimension_semantics<parallel>], iteration_bounds = array<i64: 1>, scalar_prefetch = 0 : i64, scratch_operands = 0 : i64, tpu.core_type = #tpu.core_type<tc>, window_params = [{transform_indices = @transform_0, window_bounds = array<i64: 128, 32>}, {pipeline_mode = #tpu.pipeline_mode<synchronous>, transform_indices = @transform_1, window_bounds = array<i64: 32, 128>}, {pipeline_mode = #tpu.pipeline_mode<synchronous>, transform_indices = @transform_2, window_bounds = array<i64: 1, 128>}, {pipeline_mode = #tpu.pipeline_mode<synchronous>, transform_indices = @transform_3, window_bounds = array<i64: 128, 64>}, {pipeline_mode = #tpu.pipeline_mode<synchronous>, transform_indices = @transform_4, window_bounds = array<i64: 1, 64>}, {pipeline_mode = #tpu.pipeline_mode<synchronous>, transform_indices = @transform_5, window_bounds = array<i64: 1, 64>}, {transform_indices = @transform_6, window_bounds = array<i64: 1>}, {transform_indices = @transform_7, window_bounds = array<i64: 1, 1, 128>}]} {
    %c0 = arith.constant 0 : index
    %c0_0 = arith.constant 0 : index
    %0 = vector.load %arg1[%c0, %c0_0] : memref<128x32xf32, #tpu.memory_space<vmem>>, vector<128x32xf32>
    %1 = arith.truncf %0 : vector<128x32xf32> to vector<128x32xbf16>
    %c0_1 = arith.constant 0 : index
    %c0_2 = arith.constant 0 : index
    %2 = vector.load %arg2[%c0_1, %c0_2] : memref<32x128xbf16, #tpu.memory_space<vmem>>, vector<32x128xbf16>
    %cst = arith.constant dense<0.000000e+00> : vector<128x128xf32>
    %3 = tpu.matmul %1, %2, %cst {dimension_numbers = #tpu.dot_dimension_numbers<[1], [0], [0], [1], [0, 0, 1, 1], [], []>} : vector<128x32xbf16>, vector<32x128xbf16>, vector<128x128xf32> -> vector<128x128xf32>
    %c0_3 = arith.constant 0 : index
    %c0_4 = arith.constant 0 : index
    %4 = vector.load %arg3[%c0_3, %c0_4] : memref<1x128xbf16, #tpu.memory_space<vmem>>, vector<1x128xbf16>
    %5 = arith.truncf %3 : vector<128x128xf32> to vector<128x128xbf16>
    %6 = vector.broadcast %4 : vector<1x128xbf16> to vector<128x128xbf16>
    %7 = arith.addf %5, %6 : vector<128x128xbf16>
    %cst_5 = arith.constant 0.000000e+00 : bf16
    %8 = vector.broadcast %cst_5 : bf16 to vector<128x128xbf16>
    %9 = arith.maximumf %7, %8 : vector<128x128xbf16>
    %c0_6 = arith.constant 0 : index
    %c0_7 = arith.constant 0 : index
    %10 = vector.load %arg4[%c0_6, %c0_7] : memref<128x64xbf16, #tpu.memory_space<vmem>>, vector<128x64xbf16>
    %cst_8 = arith.constant dense<0.000000e+00> : vector<128x64xf32>
    %11 = tpu.matmul %9, %10, %cst_8 {dimension_numbers = #tpu.dot_dimension_numbers<[1], [0], [0], [1], [0, 0, 1, 1], [], []>} : vector<128x128xbf16>, vector<128x64xbf16>, vector<128x64xf32> -> vector<128x64xf32>
    %c0_9 = arith.constant 0 : index
    %c0_10 = arith.constant 0 : index
    %12 = vector.load %arg5[%c0_9, %c0_10] : memref<1x64xbf16, #tpu.memory_space<vmem>>, vector<1x64xbf16>
    %13 = arith.truncf %11 : vector<128x64xf32> to vector<128x64xbf16>
    %14 = vector.broadcast %12 : vector<1x64xbf16> to vector<128x64xbf16>
    %15 = arith.addf %13, %14 : vector<128x64xbf16>
    %cst_11 = arith.constant 0.000000e+00 : bf16
    %16 = vector.broadcast %cst_11 : bf16 to vector<128x64xbf16>
    %17 = arith.maximumf %15, %16 : vector<128x64xbf16>
    %c0_12 = arith.constant 0 : index
    %c0_13 = arith.constant 0 : index
    %18 = vector.load %arg6[%c0_12, %c0_13] : memref<1x64xbf16, #tpu.memory_space<vmem>>, vector<1x64xbf16>
    %cst_14 = arith.constant dense<0.000000e+00> : vector<1x128xf32>
    %19 = tpu.matmul %18, %17, %cst_14 {dimension_numbers = #tpu.dot_dimension_numbers<[1], [1], [0], [0], [0, 0, 1, 0], [], []>} : vector<1x64xbf16>, vector<128x64xbf16>, vector<1x128xf32> -> vector<1x128xf32>
    %c0_15 = arith.constant 0 : index
    %20 = memref.load %arg7[%c0_15] : memref<1xf32, #tpu.memory_space<smem>>
    %21 = vector.broadcast %20 : f32 to vector<1x128xf32>
    %22 = arith.addf %19, %21 : vector<1x128xf32>
    %c0_16 = arith.constant 0 : index
    %c0_17 = arith.constant 0 : index
    %c0_18 = arith.constant 0 : index
    %23 = vector.load %arg8[%c0_16, %c0_17, %c0_18] : memref<1x1x128xf32, #tpu.memory_space<vmem>>, vector<1x1x128xf32>
    %24 = vector.shape_cast %23 : vector<1x1x128xf32> to vector<1x128xf32>
    %25 = vector.shape_cast %22 : vector<1x128xf32> to vector<1x1x128xf32>
    tpu.vector_store %arg8[%c0_16, %c0_17, %c0_18], %25 {strides = array<i32>} : memref<1x1x128xf32, #tpu.memory_space<vmem>>, vector<1x1x128xf32>,
    return
  }
  func.func @transform_0(%arg0: i32) -> (i32, i32) {
    %c0_i32 = arith.constant 0 : i32
    %c0_i32_0 = arith.constant 0 : i32
    return %arg0, %c0_i32 : i32, i32
  }
  func.func @transform_1(%arg0: i32) -> (i32, i32) {
    %c0_i32 = arith.constant 0 : i32
    %c0_i32_0 = arith.constant 0 : i32
    %c0_i32_1 = arith.constant 0 : i32
    return %c0_i32, %c0_i32_0 : i32, i32
  }
  func.func @transform_2(%arg0: i32) -> (i32, i32) {
    %c0_i32 = arith.constant 0 : i32
    %c0_i32_0 = arith.constant 0 : i32
    %c0_i32_1 = arith.constant 0 : i32
    return %c0_i32, %c0_i32_0 : i32, i32
  }
  func.func @transform_3(%arg0: i32) -> (i32, i32) {
    %c0_i32 = arith.constant 0 : i32
    %c0_i32_0 = arith.constant 0 : i32
    %c0_i32_1 = arith.constant 0 : i32
    return %c0_i32, %c0_i32_0 : i32, i32
  }
  func.func @transform_4(%arg0: i32) -> (i32, i32) {
    %c0_i32 = arith.constant 0 : i32
    %c0_i32_0 = arith.constant 0 : i32
    %c0_i32_1 = arith.constant 0 : i32
    return %c0_i32, %c0_i32_0 : i32, i32
  }
  func.func @transform_5(%arg0: i32) -> (i32, i32) {
    %c0_i32 = arith.constant 0 : i32
    %c0_i32_0 = arith.constant 0 : i32
    %c0_i32_1 = arith.constant 0 : i32
    return %c0_i32, %c0_i32_0 : i32, i32
  }
  func.func @transform_6(%arg0: i32) -> i32 {
    %c0_i32 = arith.constant 0 : i32
    %c0_i32_0 = arith.constant 0 : i32
    return %c0_i32 : i32
  }
  func.func @transform_7(%arg0: i32) -> (i32, i32, i32) {
    %c0_i32 = arith.constant 0 : i32
    %c0_i32_0 = arith.constant 0 : i32
    %c0_i32_1 = arith.constant 0 : i32
    return %arg0, %c0_i32, %c0_i32_0 : i32, i32, i32
  }
}

</mosaic_0001>

<bundles_post_ra>
// kernel: mlp2_forward.1
= control target key start
LH: loop header
LB: loop body
LE: loop exit
PB: predicated region body
PF: predicated region fallthrough
CT: control target
= control target key end

     0   :  { %13 = vsyncpa [#allocation4], 0  ;;  %s1082_s0 = inlined_call_operand.hbm [shape: f32[128,32], index: 0, kind: input, shape index: {}]   ;;  %s1083_s1 = inlined_call_operand.hbm [shape: bf16[32,128], index: 1, kind: input, shape index: {}]   ;;  %s1084_s2 = inlined_call_operand.hbm [shape: bf16[1,128], index: 2, kind: input, shape index: {}]   ;;  %s1085_s3 = inlined_call_operand.hbm [shape: bf16[128,64], index: 3, kind: input, shape index: {}]   ;;  %s1086_s4 = inlined_call_operand.hbm [shape: bf16[1,64], index: 4, kind: input, shape index: {}]   ;;  %s1087_s5 = inlined_call_operand.hbm [shape: bf16[1,64], index: 5, kind: input, shape index: {}]   ;;  %s1088_s6 = inlined_call_operand.<no memory space> [shape: f32[1], index: 6, kind: input, shape index: {}]   ;;  %s1089_s7 = inlined_call_operand.hbm [shape: f32[1,1,128], index: 7, kind: output, shape index: {}]  }
   0x1   :  { %14 = vsyncpa [#allocation7], 0 }
   0x2   :  { %15 = vsyncpa [#allocation10], 0 }
   0x3   :  { %16 = vsyncpa [#allocation13], 0 }
   0x4   :  { %17 = vsyncpa [#allocation5], 0  ;;  %s896_s24 = smov [#allocation6]   ;;  %s732_s28 = scalar_lea.hbm %s1083_s1, 256 }
   0x5   :  { %s35_s25 = sshll.u32 %s896_s24, 4  ;;  %p733_p0 = scmp.ne.s32.totalorder %s1083_s1, %s732_s28  ;;  %s36_s25 = int_to_ptr.vmem [resolvable:$true] %s35_s25 }
   0x6   :  { %p736_p1 = scmp.lt.u32.totalorder %s732_s28, %s1083_s1 }
   0x8   :  { %p738_p2 = pnand %p736_p1, %p733_p0 }
   0xa   :  { %741 = shalt.err (!%p738_p2)
}
   0xb   :  { %s742_s10 = scalar_lea.vmem %s36_s25, 256  ;;  %p747_p4 = scmp.lt.s32.totalorder %s36_s25, %s36_s25 }
   0xc   :  { %p743_p3 = scmp.ne.s32.totalorder %s36_s25, %s742_s10  ;;  %p748_p5 = scmp.lt.s32.totalorder %s742_s10, %s742_s10 }
   0xe   :  { %p749_p6 = por %p748_p5, %p747_p4 }
  0x10   :  { %p750_p7 = pnand %p749_p6, %p743_p3 }
  0x12   :  { %753 = shalt.err (!%p750_p7)
}
  0x13   :  { %s897_s11 = smov 64   ;;  %s898_s12 = smov 4  }
  0x14   :  { %41 = dma.hbm_to_vmem [thread:$0]  %s1083_s1, 256, %s36_s25, [#allocation7], %s897_s11, %s897_s11, %s898_s12  }
  0x15   :  { %s899_s15 = smov [#allocation9]   ;;  %s900_s17 = smov [#allocation3]  }
  0x16   :  { %s57_s16 = sshll.u32 %s899_s15, 4  ;;  %s23_s18 = sshll.u32 %s900_s17, 4  ;;  %s58_s16 = int_to_ptr.vmem [resolvable:$true] %s57_s16  ;;  %s24_s18 = int_to_ptr.vmem [resolvable:$true] %s23_s18 }
  0x17   :  { %s754_s21 = scalar_lea.hbm %s1085_s3, 1024 }
  0x18   :  { %p755_p8 = scmp.ne.s32.totalorder %s1085_s3, %s754_s21  ;;  %p758_p9 = scmp.lt.u32.totalorder %s754_s21, %s1085_s3 }
  0x1a   :  { %p760_p10 = pnand %p758_p9, %p755_p8 }
  0x1c   :  { %763 = shalt.err (!%p760_p10)
}
  0x1d   :  { %s764_s1 = scalar_lea.vmem %s58_s16, 1024  ;;  %p769_p12 = scmp.lt.s32.totalorder %s58_s16, %s58_s16 }
  0x1e   :  { %p765_p11 = scmp.ne.s32.totalorder %s58_s16, %s764_s1  ;;  %p770_p13 = scmp.lt.s32.totalorder %s764_s1, %s764_s1 }
  0x20   :  { %p771_p0 = por %p770_p13, %p769_p12 }
  0x22   :  { %p772_p1 = pnand %p771_p0, %p765_p11 }
  0x24   :  { %775 = shalt.err (!%p772_p1)
}
  0x25   :  { %63 = dma.hbm_to_vmem [thread:$0]  %s1085_s3, 1024, %s58_s16, [#allocation10], %s897_s11, %s897_s11, %s898_s12  }
  0x26   :  { %s776_s30 = scalar_lea.hbm %s1082_s0, 2048 }
  0x27   :  { %p777_p2 = scmp.ne.s32.totalorder %s1082_s0, %s776_s30  ;;  %p780_p3 = scmp.lt.u32.totalorder %s776_s30, %s1082_s0 }
  0x29   :  { %p782_p4 = pnand %p780_p3, %p777_p2 }
  0x2b   :  { %785 = shalt.err (!%p782_p4)
}
  0x2c   :  { %s786_s14 = scalar_lea.vmem %s24_s18, 2048  ;;  %p791_p6 = scmp.lt.s32.totalorder %s24_s18, %s24_s18 }
  0x2d   :  { %p787_p5 = scmp.ne.s32.totalorder %s24_s18, %s786_s14  ;;  %p792_p7 = scmp.lt.s32.totalorder %s786_s14, %s786_s14 }
  0x2f   :  { %p793_p8 = por %p792_p7, %p791_p6 }
  0x31   :  { %p794_p9 = pnand %p793_p8, %p787_p5 }
  0x33   :  { %797 = shalt.err (!%p794_p9)
}
  0x34   :  { %s901_s3 = smov 128   ;;  %s902_s11 = smov 8  }
  0x35   :  { %29 = dma.hbm_to_vmem [thread:$0]  %s1082_s0, 2048, %s24_s18, [#allocation4], %s901_s3, %s901_s3, %s902_s11  }
  0x36   :  { %s903_s16 = smov [#allocation8]   ;;  %s904_s19 = smov [#allocation11]  }
  0x37   :  { %s48_s17 = sshll.u32 %s903_s16, 4  ;;  %s70_s20 = sshll.u32 %s904_s19, 4  ;;  %s49_s17 = int_to_ptr.vmem [resolvable:$true] %s48_s17  ;;  %s71_s20 = int_to_ptr.vmem [resolvable:$true] %s70_s20 }
  0x38   :  { %s798_s23 = scalar_lea.hbm %s1084_s2, 16 }
  0x39   :  { %p799_p10 = scmp.ne.s32.totalorder %s1084_s2, %s798_s23  ;;  %p802_p11 = scmp.lt.u32.totalorder %s798_s23, %s1084_s2 }
  0x3b   :  { %p804_p12 = pnand %p802_p11, %p799_p10 }
  0x3d   :  { %807 = shalt.err (!%p804_p12)
}
  0x3e   :  { %s808_s0 = scalar_lea.vmem %s49_s17, 16  ;;  %s812_s18 = scalar_lea.vmem %s49_s17, 32 }
  0x3f   :  { %p809_p13 = scmp.ne.s32.totalorder %s49_s17, %s808_s0  ;;  %p813_p0 = scmp.lt.s32.totalorder %s49_s17, %s49_s17 }
  0x40   :  { %p814_p1 = scmp.lt.s32.totalorder %s812_s18, %s808_s0 }
  0x42   :  { %p815_p2 = por %p814_p1, %p813_p0 }
  0x44   :  { %p816_p3 = pnand %p815_p2, %p809_p13 }
  0x46   :  { %819 = shalt.err (!%p816_p3)
}
  0x47   :  { %51 = dma.hbm_to_vmem [thread:$0]  %s1084_s2, 16, %s49_s17, [#allocation7]  }
  0x48   :  { %s820_s8 = scalar_lea.hbm %s1086_s4, 16 }
  0x49   :  { %p821_p4 = scmp.ne.s32.totalorder %s1086_s4, %s820_s8  ;;  %p824_p5 = scmp.lt.u32.totalorder %s820_s8, %s1086_s4 }
  0x4b   :  { %p826_p6 = pnand %p824_p5, %p821_p4 }
  0x4d   :  { %829 = shalt.err (!%p826_p6)
}
  0x4e   :  { %s830_s3 = scalar_lea.vmem %s71_s20, 16  ;;  %s834_s11 = scalar_lea.vmem %s71_s20, 32 }
  0x4f   :  { %p831_p7 = scmp.ne.s32.totalorder %s71_s20, %s830_s3  ;;  %p835_p8 = scmp.lt.s32.totalorder %s71_s20, %s71_s20 }
  0x50   :  { %p836_p9 = scmp.lt.s32.totalorder %s834_s11, %s830_s3 }
  0x52   :  { %p837_p10 = por %p836_p9, %p835_p8 }
  0x54   :  { %p838_p11 = pnand %p837_p10, %p831_p7 }
  0x56   :  { %841 = shalt.err (!%p838_p11)
}
  0x57   :  { %73 = dma.hbm_to_vmem [thread:$0]  %s1086_s4, 16, %s71_s20, [#allocation10]  }
  0x58   :  { %s905_s15 = smov [#allocation12]   ;;  %s842_s21 = scalar_lea.hbm %s1087_s5, 16 }
  0x59   :  { %s80_s16 = sshll.u32 %s905_s15, 4  ;;  %p843_p12 = scmp.ne.s32.totalorder %s1087_s5, %s842_s21  ;;  %s81_s16 = int_to_ptr.vmem [resolvable:$true] %s80_s16 }
  0x5a   :  { %p846_p13 = scmp.lt.u32.totalorder %s842_s21, %s1087_s5 }
  0x5c   :  { %p848_p0 = pnand %p846_p13, %p843_p12 }
  0x5e   :  { %851 = shalt.err (!%p848_p0)
}
  0x5f   :  { %s852_s1 = scalar_lea.vmem %s81_s16, 16  ;;  %s856_s4 = scalar_lea.vmem %s81_s16, 32 }
  0x60   :  { %p853_p1 = scmp.ne.s32.totalorder %s81_s16, %s852_s1  ;;  %p857_p2 = scmp.lt.s32.totalorder %s81_s16, %s81_s16 }
  0x61   :  { %p858_p3 = scmp.lt.s32.totalorder %s856_s4, %s852_s1 }
  0x63   :  { %p859_p4 = por %p858_p3, %p857_p2 }
  0x65   :  { %p860_p5 = pnand %p859_p4, %p853_p1 }
  0x67   :  { %863 = shalt.err (!%p860_p5)
}
  0x68   :  { %83 = dma.hbm_to_vmem [thread:$0]  %s1087_s5, 16, %s81_s16, [#allocation13]  }
  0x69   :  { %886 = dma.done.wait [#allocation4], 2048  }
  0x6a   :  { %887 = vsyncadd [#allocation4], 4294965248 }
  0x6b   :  { %888 = dma.done.wait [#allocation7], 272  }
  0x6c   :  { %889 = vsyncadd [#allocation7], 4294967024 }
  0x6d   :  { %890 = dma.done.wait [#allocation10], 1040  }
  0x6e   :  { %891 = vsyncadd [#allocation10], 4294966256 }
  0x6f   :  { %892 = dma.done.wait [#allocation13], 16  }
  0x70   :  { %893 = vsyncadd [#allocation13], 4294967280  ;;  %v722_v0 = vld [vmem:[#allocation6] sm:$0xff]   ;;  %v723_v1 = vld [vmem:[#allocation6 + $0x8] sm:$0xff]   ;;  %vm145_vm0 = vcmask 261120   ;;  %v279_v34 = vlaneseq  ;;  %v906_v49 = vmov 0  }
  0x71   :  { %636 = vmatprep.subr.bf16.mxu1 %v722_v0  ;;  %v105_v2 = vld [vmem:[#allocation3] sm:$0xff]  ;;  %v106_v3 = vld [vmem:[#allocation3 + $0x8] sm:$0xff]  ;;  %v107_v5 = vld [vmem:[#allocation3 + $0x10] sm:$0xff]  ;;  %vm908_vm1 = vmmov 0   ;;  %vm495_vm2 = vcmask 523264   ;;  %s909_s18 = smov [#allocation14]  }
  0x72   :  { %637 = vmatpush3.bf16.msra.mxu1 %v722_v0  ;;  %v121_v4 = vpack.c.bf16 %v106_v3, %v105_v2  ;;  %v108_v6 = vld [vmem:[#allocation3 + $0x18] sm:$0xff]  ;;  %v109_v7 = vld [vmem:[#allocation3 + $0x20] sm:$0xff]  ;;  %v110_v8 = vld [vmem:[#allocation3 + $0x28] sm:$0xff]  ;;  %v1030_v35 = vshrl.u32 %v279_v34, 7  ;;  %s570_s27 = sshll.u32 %s909_s18, 4  ;;  %s571_s27 = int_to_ptr.vmem [resolvable:$true] %s570_s27 }
  0x73   :  { %638 = vmatprep.subr.bf16.mxu1 %v723_v1  ;;  %v122_v9 = vpack.c.bf16 %v108_v6, %v107_v5  ;;  %v123_v10 = vpack.c.bf16 %v110_v8, %v109_v7  ;;  %v724_v11 = vld [vmem:[#allocation9] sm:$0xff]   ;;  %v725_v14 = vld [vmem:[#allocation9 + $0x8] sm:$0xff]   ;;  %v114_v16 = vld [vmem:[#allocation3 + $0x48] sm:$0xff]  ;;  %s864_s28 = scalar_lea.vmem %s571_s27, 16  ;;  %s868_s29 = scalar_lea.vmem %s571_s27, 32 }
  0x74   :  { %640 = vmatprep.mubr.msk.bf16.mxu1 %vm145_vm0, %v121_v4  ;;  %v111_v12 = vld [vmem:[#allocation3 + $0x30] sm:$0xff]  ;;  %v112_v13 = vld [vmem:[#allocation3 + $0x38] sm:$0xff]  ;;  %v113_v15 = vld [vmem:[#allocation3 + $0x40] sm:$0xff]  ;;  %v281_v38 = vsub.s32 0, %v1030_v35  ;;  %p865_p6 = scmp.ne.s32.totalorder %s571_s27, %s864_s28  ;;  %p869_p7 = scmp.lt.s32.totalorder %s571_s27, %s571_s27 }
  0x75   :  { %v726_v17 = vld [vmem:[#allocation9 + $0x10] sm:$0xff]   ;;  %v124_v18 = vpack.c.bf16 %v112_v13, %v111_v12  ;;  %v125_v19 = vpack.c.bf16 %v114_v16, %v113_v15  ;;  %v727_v20 = vld [vmem:[#allocation9 + $0x18] sm:$0xff]   ;;  %v116_v22 = vld [vmem:[#allocation3 + $0x58] sm:$0xff]  ;;  %p870_p8 = scmp.lt.s32.totalorder %s868_s29, %s864_s28 }
  0x76   :  { %639 = vmatpush3.bf16.msra.mxu1 %v723_v1  ;;  %v115_v21 = vld [vmem:[#allocation3 + $0x50] sm:$0xff]  ;;  %v117_v23 = vld [vmem:[#allocation3 + $0x60] sm:$0xff]  ;;  %v118_v24 = vld [vmem:[#allocation3 + $0x68] sm:$0xff] }
  0x77   :  { %656 = vmatprep.subr.bf16.mxu1 %v724_v11  ;;  %v728_v25 = vld [vmem:[#allocation9 + $0x20] sm:$0xff]   ;;  %v126_v26 = vpack.c.bf16 %v116_v22, %v115_v21  ;;  %v127_v27 = vpack.c.bf16 %v118_v24, %v117_v23  ;;  %v729_v28 = vld [vmem:[#allocation9 + $0x28] sm:$0xff]   ;;  %v730_v32 = vld [vmem:[#allocation9 + $0x30] sm:$0xff]   ;;  %p871_p9 = por %p870_p8, %p869_p7 }
  0x78   :  { %v119_v29 = vld [vmem:[#allocation3 + $0x70] sm:$0xff]  ;;  %v120_v30 = vld [vmem:[#allocation3 + $0x78] sm:$0xff] }
  0x79   :  { %641 = vmatmul.mubr.msk.bf16.vlgmr.msra.gmra.mrb[0].mxu1 %vm145_vm0, %v122_v9  ;;  %v128_v31 = vpack.c.bf16 %v120_v30, %v119_v29  ;;  %v731_v33 = vld [vmem:[#allocation9 + $0x38] sm:$0xff]   ;;  %p872_p10 = pnand %p871_p9, %p865_p6 }
  0x7a   :  { %644 = vmatprep.mubr.msk.bf16.mxu1 %vm145_vm0, %v123_v10  ;;  %657 = vmatpush3.bf16.msra.mxu1 %v724_v11  ;;  %v267_v36 = vld [vmem:[#allocation8] sm:$0x1] }
  0x7b   :  { %658 = vmatprep.subr.bf16.mxu1 %v725_v14  ;;  %v277_v37 = vpack.i.b16 %v267_v36, %v267_v36 }
  0x7d   :  { %v282_v41 = vrot.slane %v277_v37, %v281_v38 }
  0x7e   :  { %659 = vmatpush3.bf16.msra.mxu1 %v725_v14 }
  0x7f   :  { %660 = vmatprep.subr.bf16.mxu1 %v726_v17 }
  0x81   :  { %645 = vmatmul.mubr.msk.bf16.gmra.mrb[4].mxu1 %vm145_vm0, %v124_v18  ;;  %v460_v18 = vld [vmem:[#allocation11] sm:$0x1] }
  0x82   :  { %648 = vmatprep.mubr.msk.bf16.mxu1 %vm145_vm0, %v125_v19  ;;  %661 = vmatpush3.bf16.msra.mxu1 %v726_v17  ;;  %v907_v17 = vmov 0.0   ;;  %v470_v19 = vpack.i.b16 %v460_v18, %v460_v18 }
  0x83   :  { %662 = vmatprep.subr.bf16.mxu1 %v727_v20  ;;  %688 = vmatprep.subr.bf16.mxu0 %v907_v17 }
  0x84   :  { %704 = vmatprep.mubr.msk.bf16.mxu0 %vm908_vm1, %v907_v17  ;;  %v475_v23 = vrot.slane %v470_v19, %v281_v38 }
  0x86   :  { %663 = vmatpush3.bf16.msra.mxu1 %v727_v20 }
  0x87   :  { %664 = vmatprep.subr.bf16.mxu1 %v728_v25 }
  0x89   :  { %649 = vmatmul.mubr.msk.bf16.gmra.mrb[8].mxu1 %vm145_vm0, %v126_v26 }
  0x8a   :  { %652 = vmatprep.mubr.msk.bf16.mxu1 %vm145_vm0, %v127_v27  ;;  %665 = vmatpush3.bf16.msra.mxu1 %v728_v25 }
  0x8b   :  { %666 = vmatprep.subr.bf16.mxu1 %v729_v28 }
  0x8e   :  { %667 = vmatpush3.bf16.msra.mxu1 %v729_v28 }
  0x8f   :  { %668 = vmatprep.subr.bf16.mxu1 %v730_v32 }
  0x91   :  { %653 = vmatmul.mubr.msk.bf16.gmra.mrb[12].mxu1 %vm145_vm0, %v128_v31 }
  0x92   :  { %669 = vmatpush3.bf16.msra.mxu1 %v730_v32 }
  0x93   :  { %670 = vmatprep.subr.bf16.mxu1 %v731_v33 }
  0x96   :  { %671 = vmatpush3.bf16.msra.mxu1 %v731_v33 }
 0x14c   :  { %v642_v39 = vpop.f32.mrb[0].mxu1 }
 0x14d   :  { %v204_v40 = vpop.f32.mrb[1].mxu1 }
 0x14e   :  { %v643_v42 = vpop.f32.mrb[2].mxu1 }
 0x14f   :  { %v269_v43 = vpack.c.bf16 %v643_v42, %v642_v39  ;;  %v207_v44 = vpop.f32.mrb[3].mxu1 }
 0x150   :  { %v268_v45 = vpack.c.bf16 %v207_v44, %v204_v40 }
 0x151   :  { %v284_v46 = vadd.bf16 %v282_v41, %v269_v43 }
 0x152   :  { %v283_v47 = vadd.bf16 %v282_v41, %v268_v45 }
 0x153   :  { %v292_v51 = vmax.bf16 %v906_v49, %v284_v46 }
 0x154   :  { %v646_v48 = vpop.f32.mrb[4].mxu1  ;;  %v291_v50 = vmax.bf16 %v906_v49, %v283_v47 }
 0x155   :  { %v220_v52 = vpop.f32.mrb[5].mxu1 }
 0x156   :  { %672 = vmatprep.mubr.bf16.mxu1 %v291_v50  ;;  %v647_v53 = vpop.f32.mrb[6].mxu1 }
 0x157   :  { %v271_v54 = vpack.c.bf16 %v647_v53, %v646_v48  ;;  %673 = vmatmul.mubr.bf16.vlgmr.msra.gmra.mrb[16].mxu1 %v292_v51  ;;  %v223_v55 = vpop.f32.mrb[7].mxu1 }
 0x158   :  { %v270_v56 = vpack.c.bf16 %v223_v55, %v220_v52 }
 0x159   :  { %v286_v57 = vadd.bf16 %v282_v41, %v271_v54 }
 0x15a   :  { %v285_v58 = vadd.bf16 %v282_v41, %v270_v56 }
 0x15b   :  { %v294_v59 = vmax.bf16 %v906_v49, %v286_v57 }
 0x15c   :  { %v293_v60 = vmax.bf16 %v906_v49, %v285_v58  ;;  %v650_v61 = vpop.f32.mrb[8].mxu1 }
 0x15d   :  { %v236_v62 = vpop.f32.mrb[9].mxu1 }
 0x15e   :  { %676 = vmatprep.mubr.bf16.mxu1 %v293_v60  ;;  %v651_v63 = vpop.f32.mrb[10].mxu1 }
 0x15f   :  { %677 = vmatmul.mubr.bf16.gmra.mrb[20].mxu1 %v294_v59  ;;  %v273_v0 = vpack.c.bf16 %v651_v63, %v650_v61  ;;  %v239_v1 = vpop.f32.mrb[11].mxu1 }
 0x160   :  { %v272_v2 = vpack.c.bf16 %v239_v1, %v236_v62 }
 0x161   :  { %v288_v3 = vadd.bf16 %v282_v41, %v273_v0 }
 0x162   :  { %v287_v4 = vadd.bf16 %v282_v41, %v272_v2 }
 0x163   :  { %v296_v5 = vmax.bf16 %v906_v49, %v288_v3 }
 0x164   :  { %v295_v6 = vmax.bf16 %v906_v49, %v287_v4  ;;  %v654_v7 = vpop.f32.mrb[12].mxu1 }
 0x165   :  { %v252_v8 = vpop.f32.mrb[13].mxu1 }
 0x166   :  { %680 = vmatprep.mubr.bf16.mxu1 %v295_v6  ;;  %v655_v9 = vpop.f32.mrb[14].mxu1  ;;  %v492_v6 = vld [vmem:[#allocation12] sm:$0x1] }
 0x167   :  { %681 = vmatmul.mubr.bf16.gmra.mrb[24].mxu1 %v296_v5  ;;  %v275_v10 = vpack.c.bf16 %v655_v9, %v654_v7  ;;  %v255_v11 = vpop.f32.mrb[15].mxu1  ;;  %v494_v7 = vstv %s1088_s6 }
 0x168   :  { %v274_v12 = vpack.c.bf16 %v255_v11, %v252_v8 }
 0x169   :  { %v290_v13 = vadd.bf16 %v282_v41, %v275_v10 }
 0x16a   :  { %v289_v14 = vadd.bf16 %v282_v41, %v274_v12 }
 0x16b   :  { %v298_v15 = vmax.bf16 %v906_v49, %v290_v13 }
 0x16c   :  { %v297_v16 = vmax.bf16 %v906_v49, %v289_v14 }
 0x16e   :  { %684 = vmatprep.mubr.bf16.mxu1 %v297_v16 }
 0x16f   :  { %685 = vmatmul.mubr.bf16.gmra.mrb[28].mxu1 %v298_v15 }
 0x22a   :  { %v674_v20 = vpop.f32.mrb[16].mxu1 }
 0x22b   :  { %v397_v21 = vpop.f32.mrb[17].mxu1 }
 0x22c   :  { %v675_v22 = vpop.f32.mrb[18].mxu1 }
 0x22d   :  { %v462_v24 = vpack.c.bf16 %v675_v22, %v674_v20  ;;  %v400_v25 = vpop.f32.mrb[19].mxu1 }
 0x22e   :  { %v461_v26 = vpack.c.bf16 %v400_v25, %v397_v21 }
 0x22f   :  { %v477_v31 = vadd.bf16 %v475_v23, %v462_v24 }
 0x230   :  { %v476_v27 = vadd.bf16 %v475_v23, %v461_v26 }
 0x231   :  { %v485_v37 = vmax.bf16 %v906_v49, %v477_v31 }
 0x232   :  { %v678_v28 = vpop.f32.mrb[20].mxu1  ;;  %v484_v29 = vmax.bf16 %v906_v49, %v476_v27 }
 0x233   :  { %v413_v30 = vpop.f32.mrb[21].mxu1  ;;  %v503_v41 = vsel %vm495_vm2, %v485_v37, 0 }
 0x234   :  { %v679_v32 = vpop.f32.mrb[22].mxu1  ;;  %v500_v33 = vsel %vm495_vm2, %v484_v29, 0 }
 0x235   :  { %v464_v34 = vpack.c.bf16 %v679_v32, %v678_v28  ;;  %689 = vmatpush3.bf16.xpose.msra.mxu0 %v500_v33  ;;  %v416_v35 = vpop.f32.mrb[23].mxu1 }
 0x236   :  { %v463_v36 = vpack.c.bf16 %v416_v35, %v413_v30  ;;  %690 = vmatprep.subr.bf16.mxu0 %v907_v17 }
 0x237   :  { %v479_v50 = vadd.bf16 %v475_v23, %v464_v34 }
 0x238   :  { %v478_v40 = vadd.bf16 %v475_v23, %v463_v36 }
 0x239   :  { %v487_v56 = vmax.bf16 %v906_v49, %v479_v50 }
 0x23a   :  { %v682_v38 = vpop.f32.mrb[24].mxu1  ;;  %v486_v46 = vmax.bf16 %v906_v49, %v478_v40 }
 0x23b   :  { %v429_v39 = vpop.f32.mrb[25].mxu1  ;;  %v509_v58 = vsel %vm495_vm2, %v487_v56, 0 }
 0x23c   :  { %v683_v42 = vpop.f32.mrb[26].mxu1  ;;  %v506_v51 = vsel %vm495_vm2, %v486_v46, 0 }
 0x23d   :  { %691 = vmatpush3.bf16.xpose.msra.mxu0 %v503_v41  ;;  %v466_v43 = vpack.c.bf16 %v683_v42, %v682_v38  ;;  %v432_v44 = vpop.f32.mrb[27].mxu1 }
 0x23e   :  { %692 = vmatprep.subr.bf16.mxu0 %v907_v17  ;;  %v465_v45 = vpack.c.bf16 %v432_v44, %v429_v39 }
 0x23f   :  { %v481_v60 = vadd.bf16 %v475_v23, %v466_v43 }
 0x240   :  { %v480_v57 = vadd.bf16 %v475_v23, %v465_v45 }
 0x241   :  { %v489_v62 = vmax.bf16 %v906_v49, %v481_v60 }
 0x242   :  { %v686_v47 = vpop.f32.mrb[28].mxu1  ;;  %v488_v59 = vmax.bf16 %v906_v49, %v480_v57 }
 0x243   :  { %v445_v48 = vpop.f32.mrb[29].mxu1  ;;  %v515_v0 = vsel %vm495_vm2, %v489_v62, 0 }
 0x244   :  { %v687_v52 = vpop.f32.mrb[30].mxu1  ;;  %v512_v61 = vsel %vm495_vm2, %v488_v59, 0 }
 0x245   :  { %693 = vmatpush3.bf16.xpose.msra.mxu0 %v506_v51  ;;  %v468_v53 = vpack.c.bf16 %v687_v52, %v686_v47  ;;  %v448_v54 = vpop.f32.mrb[31].mxu1 }
 0x246   :  { %694 = vmatprep.subr.bf16.mxu0 %v907_v17  ;;  %v467_v55 = vpack.c.bf16 %v448_v54, %v445_v48 }
 0x247   :  { %v483_v2 = vadd.bf16 %v475_v23, %v468_v53 }
 0x248   :  { %v482_v63 = vadd.bf16 %v475_v23, %v467_v55 }
 0x249   :  { %v491_v4 = vmax.bf16 %v906_v49, %v483_v2 }
 0x24a   :  { %v490_v1 = vmax.bf16 %v906_v49, %v482_v63 }
 0x24b   :  { %v521_v5 = vsel %vm495_vm2, %v491_v4, 0 }
 0x24c   :  { %v518_v3 = vsel %vm495_vm2, %v490_v1, 0 }
 0x24d   :  { %695 = vmatpush3.bf16.xpose.msra.mxu0 %v509_v58 }
 0x24e   :  { %696 = vmatprep.subr.bf16.mxu0 %v907_v17 }
 0x255   :  { %697 = vmatpush3.bf16.xpose.msra.mxu0 %v512_v61 }
 0x256   :  { %698 = vmatprep.subr.bf16.mxu0 %v907_v17 }
 0x25d   :  { %699 = vmatpush3.bf16.xpose.msra.mxu0 %v515_v0 }
 0x25e   :  { %700 = vmatprep.subr.bf16.mxu0 %v907_v17 }
 0x265   :  { %701 = vmatpush3.bf16.xpose.msra.mxu0 %v518_v3 }
 0x266   :  { %702 = vmatprep.subr.bf16.mxu0 %v907_v17 }
 0x26d   :  { %703 = vmatpush3.bf16.xpose.msra.mxu0 %v521_v5 }
 0x274   :  { %705 = vmatmul.mubr.msk.bf16.vlgmr.msra.gmra.mrb[0].mxu0 %vm495_vm2, %v492_v6 }
 0x347   :  { %v557_v8 = vpop.f32.mrb[0].mxu0 }
 0x348   :  { %v558_v9 = vadd.f32 %v557_v8, %v494_v7  ;;  %v706_v10 = vpop.f32.mrb[1].mxu0 }
 0x349   :  { %v560_v11 = vpop.f32.mrb[2].mxu0 }
 0x34a   :  { %563 = vst [vmem:[#allocation14] sm:$0x1] %v558_v9  ;;  %v707_v12 = vpop.f32.mrb[3].mxu0 }
 0x34b   :  { %875 = shalt.err (!%p872_p10)
}
 0x34c   :  { %s876_s6 = scalar_lea.hbm %s1089_s7, 16 }
 0x34d   :  { %p877_p11 = scmp.ne.s32.totalorder %s1089_s7, %s876_s6  ;;  %p880_p12 = scmp.lt.u32.totalorder %s876_s6, %s1089_s7 }
 0x34f   :  { %p882_p13 = pnand %p880_p12, %p877_p11 }
 0x351   :  { %885 = shalt.err (!%p882_p13)
}
 0x352   :  { %573 = dma.vmem_to_hbm [thread:$0]  %s571_s27, 16, %s1089_s7, [#allocation5]  }
 0x353   :  { %894 = dma.done.wait [#allocation5], 16  }
 0x354   :  { %895 = vsyncadd [#allocation5], 4294967280 }
 0x355   :  { %577 = vsyncpa [#allocation4], 1 }
 0x356   :  { %578 = vsyncpa [#allocation7], 1 }
 0x357   :  { %579 = vsyncpa [#allocation10], 1 }
 0x358   :  { %580 = vsyncpa [#allocation13], 1 }
 0x359   :  { %581 = vsyncpa [#allocation5], 1 }

</bundles_post_ra>
